<compile_context>
chip_gen: v5e
topology: v5e:2x2
jax: 0.10.0
libtpu: 0.0.40
codegen_flags: <defaults>
</compile_context>

<pallas_src>
import jax
import jax.numpy as jnp
from jax.experimental import pallas as pl
from jax.experimental.pallas import tpu as pltpu


def _vmlp_kernel(x_ref, w1_ref, b1_ref, wh_ref, bh_ref, eps_ref, out_ref):
    z_dim = eps_ref.shape[-1]

    # Hidden layer: Linear + ReLU (MXU matmul, f32 accumulation; VPU max).
    h = jnp.dot(x_ref[...], w1_ref[...], preferred_element_type=jnp.float32)
    h = jnp.maximum(h + b1_ref[...], 0.0)

    # Fused heads: one matmul producing [logvar | mu] along the lane axis.
    # Cast h to the weight dtype so a bf16 weight path keeps bf16 MXU operands
    # (no-op when weights are f32); accumulation is always f32.
    heads = jnp.dot(h.astype(wh_ref.dtype), wh_ref[...],
                    preferred_element_type=jnp.float32)
    heads = heads + bh_ref[...]
    logvar = heads[:, :z_dim]
    mu = heads[:, z_dim:]

    # Reparameterization: sigma = sqrt(exp(logvar)) = exp(0.5 * logvar) (EUP).
    z = jnp.exp(0.5 * logvar) * eps_ref[...] + mu

    # Lane-dense output slab: [logvar | mu | z | 0-pad].  `heads` is already
    # [logvar|mu]-contiguous in lanes, so store it directly (no concatenate).
    out_ref[:, : 2 * z_dim] = heads
    out_ref[:, 2 * z_dim : 3 * z_dim] = z
    if out_ref.shape[-1] > 3 * z_dim:                      # static (trace-time)
        out_ref[:, 3 * z_dim :] = jnp.zeros(
            (out_ref.shape[0], out_ref.shape[-1] - 3 * z_dim), jnp.float32)


def _pick_tile_b(batch):
    """Largest useful batch tile: full batch when small, else 512/256/128."""
    if batch <= 512:
        return batch                      # single block; block == full dim is legal
    for t in (512, 256, 128):
        if batch % t == 0:
            return t
    # Ragged large batch: fall back to one block.  TODO(synk): pad batch to a
    # multiple of 128 (with row masking) instead for very large ragged inputs.
    return batch


def variational_mlp_forward(x, w1, b1, w_lv, b_lv, w_mu, b_mu, eps,
                            *, tile_b=None, matmul_dtype=None):
    """Whole VariationalMLP forward in one Pallas kernel (batch-tiled grid)."""
    batch, in_features = x.shape
    hidden_dim = w1.shape[1]
    z_dim = w_mu.shape[1]

    if tile_b is None:
        tile_b = _pick_tile_b(batch)
    assert batch % tile_b == 0, "batch must be a multiple of tile_b"
    grid = (batch // tile_b,)

    # Optional bf16 MXU operands (v6e/v7x win); biases / post-matmul math stay f32.
    if matmul_dtype is not None:
        x_mm = x.astype(matmul_dtype)
        w1_mm = w1.astype(matmul_dtype)
        w_heads = jnp.concatenate([w_lv, w_mu], axis=1).astype(matmul_dtype)
    else:
        x_mm, w1_mm = x, w1
        w_heads = jnp.concatenate([w_lv, w_mu], axis=1)     # (hidden, 2*z_dim)
    b_heads = jnp.concatenate([b_lv, b_mu], axis=1)         # (1, 2*z_dim), f32

    # Lane-dense output slab width (multiple of 128).
    out_w = ((3 * z_dim + 127) // 128) * 128

    in_specs = [
        pl.BlockSpec((tile_b, in_features), lambda i: (i, 0)),   # x: batch tiles
        pl.BlockSpec(w1_mm.shape, lambda i: (0, 0)),             # resident weights
        pl.BlockSpec(b1.shape, lambda i: (0, 0)),
        pl.BlockSpec(w_heads.shape, lambda i: (0, 0)),
        pl.BlockSpec(b_heads.shape, lambda i: (0, 0)),
        pl.BlockSpec((tile_b, z_dim), lambda i: (i, 0)),         # eps: batch tiles
    ]
    out_specs = pl.BlockSpec((tile_b, out_w), lambda i: (i, 0))
    out_shape = jax.ShapeDtypeStruct((batch, out_w), jnp.float32)

    # VMEM budget: double-buffered streamed tiles + resident weights, with slack.
    def _nbytes(a):
        return a.size * a.dtype.itemsize
    stream_bytes = (tile_b * in_features * x_mm.dtype.itemsize
                    + tile_b * z_dim * eps.dtype.itemsize
                    + tile_b * out_w * 4)
    resident_bytes = _nbytes(w1_mm) + _nbytes(b1) + _nbytes(w_heads) + _nbytes(b_heads)
    vmem_need = 2 * stream_bytes + 2 * resident_bytes
    vmem_limit = int(min(max(2 * vmem_need, 32 << 20), 48 << 20))

    flops = 2 * batch * (in_features * hidden_dim + hidden_dim * 2 * z_dim)
    bytes_accessed = (_nbytes(x_mm) + _nbytes(w1_mm) + _nbytes(b1)
                      + _nbytes(w_heads) + _nbytes(b_heads) + _nbytes(eps)
                      + batch * out_w * 4)
    cost = pl.CostEstimate(flops=flops,
                           transcendentals=batch * z_dim,
                           bytes_accessed=bytes_accessed)

    slab = pl.pallas_call(
        _vmlp_kernel,
        out_shape=out_shape,
        grid=grid,
        in_specs=in_specs,
        out_specs=out_specs,
        compiler_params=pltpu.CompilerParams(
            dimension_semantics=("parallel",),
            vmem_limit_bytes=vmem_limit),
        cost_estimate=cost,
    )(x_mm, w1_mm, b1, w_heads, b_heads, eps)

    # Slab layout: [logvar | mu | z | pad].  (For fusion-friendly consumers the
    # padded slab itself could be returned instead of re-slicing.)
    logvar = slab[:, :z_dim]
    mu = slab[:, z_dim:2 * z_dim]
    z = slab[:, 2 * z_dim:3 * z_dim]
    return z, logvar, mu


def _init_linear(key, in_dim, out_dim):
    """Deterministic PyTorch-style init; weight stored as (in_dim, out_dim)."""
    kw, kb = jax.random.split(key)
    bound = 1.0 / jnp.sqrt(in_dim)
    w = jax.random.uniform(kw, (in_dim, out_dim), jnp.float32, -bound, bound)
    b = jax.random.uniform(kb, (1, out_dim), jnp.float32, -bound, bound)
    return w, b


if __name__ == "__main__":
    in_features, hidden_dim, z_dim = 16, 32, 8

    key = jax.random.PRNGKey(0)
    k1, k2, k3 = jax.random.split(key, 3)
    w1, b1 = _init_linear(k1, in_features, hidden_dim)
    w_lv, b_lv = _init_linear(k2, hidden_dim, z_dim)
    w_mu, b_mu = _init_linear(k3, hidden_dim, z_dim)

    def reference(x, eps):
        h = jnp.maximum(x @ w1 + b1, 0.0)
        lv = h @ w_lv + b_lv
        mu = h @ w_mu + b_mu
        return jnp.exp(0.5 * lv) * eps + mu, lv, mu

    def run_and_check(batch, matmul_dtype, rtol, atol):
        kx, keps = jax.random.split(jax.random.fold_in(key, batch))
        x = jax.random.normal(kx, (batch, in_features), jnp.float32)
        eps = jax.random.normal(keps, (batch, z_dim), jnp.float32)
        z, lv, mu = variational_mlp_forward(
            x, w1, b1, w_lv, b_lv, w_mu, b_mu, eps, matmul_dtype=matmul_dtype)
        jax.block_until_ready((z, lv, mu))
        z_r, lv_r, mu_r = reference(x, eps)
        assert jnp.allclose(lv, lv_r, rtol=rtol, atol=atol), "logvar mismatch"
        assert jnp.allclose(mu, mu_r, rtol=rtol, atol=atol), "mu mismatch"
        assert jnp.allclose(z, z_r, rtol=rtol, atol=atol), "z mismatch"

    # Small demo shape: whole batch in one block (grid=(1,)), f32 matmuls.
    run_and_check(batch=32, matmul_dtype=None, rtol=1e-5, atol=1e-5)
    # Larger batch: exercises the tiled grid path (tile_b=512, grid=(2,)).
    run_and_check(batch=1024, matmul_dtype=None, rtol=1e-5, atol=1e-5)
    # bf16 matmul operands (v6e/v7x MXU fast path), f32 accumulation/epilogue.
    run_and_check(batch=1024, matmul_dtype=jnp.bfloat16, rtol=1e-1, atol=1e-1)

    print("KERNEL_OK")
</pallas_src>

<mosaic_0001>
module attributes {stable_mosaic.version = 11 : i64} {
  func.func @_vmlp_kernel(%arg0: i32, %arg1: memref<32x16xf32, #tpu.memory_space<vmem>>, %arg2: memref<16x32xf32, #tpu.memory_space<vmem>>, %arg3: memref<1x32xf32, #tpu.memory_space<vmem>>, %arg4: memref<32x16xf32, #tpu.memory_space<vmem>>, %arg5: memref<1x16xf32, #tpu.memory_space<vmem>>, %arg6: memref<32x8xf32, #tpu.memory_space<vmem>>, %arg7: memref<32x128xf32, #tpu.memory_space<vmem>>) attributes {dimension_semantics = [#tpu.dimension_semantics<parallel>], iteration_bounds = array<i64: 1>, scalar_prefetch = 0 : i64, scratch_operands = 0 : i64, tpu.core_type = #tpu.core_type<tc>, window_params = [{transform_indices = @transform_0, window_bounds = array<i64: 32, 16>}, {pipeline_mode = #tpu.pipeline_mode<synchronous>, transform_indices = @transform_1, window_bounds = array<i64: 16, 32>}, {pipeline_mode = #tpu.pipeline_mode<synchronous>, transform_indices = @transform_2, window_bounds = array<i64: 1, 32>}, {pipeline_mode = #tpu.pipeline_mode<synchronous>, transform_indices = @transform_3, window_bounds = array<i64: 32, 16>}, {pipeline_mode = #tpu.pipeline_mode<synchronous>, transform_indices = @transform_4, window_bounds = array<i64: 1, 16>}, {transform_indices = @transform_5, window_bounds = array<i64: 32, 8>}, {transform_indices = @transform_6, window_bounds = array<i64: 32, 128>}]} {
    %c0 = arith.constant 0 : index
    %c0_0 = arith.constant 0 : index
    %0 = vector.load %arg1[%c0, %c0_0] : memref<32x16xf32, #tpu.memory_space<vmem>>, vector<32x16xf32>
    %c0_1 = arith.constant 0 : index
    %c0_2 = arith.constant 0 : index
    %1 = vector.load %arg2[%c0_1, %c0_2] : memref<16x32xf32, #tpu.memory_space<vmem>>, vector<16x32xf32>
    %cst = arith.constant dense<0.000000e+00> : vector<32x32xf32>
    %2 = tpu.matmul %0, %1, %cst {dimension_numbers = #tpu.dot_dimension_numbers<[1], [0], [0], [1], [0, 0, 1, 1], [], []>} : vector<32x16xf32>, vector<16x32xf32>, vector<32x32xf32> -> vector<32x32xf32>
    %c0_3 = arith.constant 0 : index
    %c0_4 = arith.constant 0 : index
    %3 = vector.load %arg3[%c0_3, %c0_4] : memref<1x32xf32, #tpu.memory_space<vmem>>, vector<1x32xf32>
    %4 = vector.broadcast %3 : vector<1x32xf32> to vector<32x32xf32>
    %5 = arith.addf %2, %4 : vector<32x32xf32>
    %cst_5 = arith.constant 0.000000e+00 : f32
    %6 = vector.broadcast %cst_5 : f32 to vector<32x32xf32>
    %7 = arith.maximumf %5, %6 : vector<32x32xf32>
    %c0_6 = arith.constant 0 : index
    %c0_7 = arith.constant 0 : index
    %8 = vector.load %arg4[%c0_6, %c0_7] : memref<32x16xf32, #tpu.memory_space<vmem>>, vector<32x16xf32>
    %cst_8 = arith.constant dense<0.000000e+00> : vector<32x16xf32>
    %9 = tpu.matmul %7, %8, %cst_8 {dimension_numbers = #tpu.dot_dimension_numbers<[1], [0], [0], [1], [0, 0, 1, 1], [], []>} : vector<32x32xf32>, vector<32x16xf32>, vector<32x16xf32> -> vector<32x16xf32>
    %c0_9 = arith.constant 0 : index
    %c0_10 = arith.constant 0 : index
    %10 = vector.load %arg5[%c0_9, %c0_10] : memref<1x16xf32, #tpu.memory_space<vmem>>, vector<1x16xf32>
    %11 = vector.broadcast %10 : vector<1x16xf32> to vector<32x16xf32>
    %12 = arith.addf %9, %11 : vector<32x16xf32>
    %13 = vector.extract_strided_slice %12 {offsets = [0, 0], sizes = [32, 8], strides = [1, 1]} : vector<32x16xf32> to vector<32x8xf32>
    %14 = vector.extract_strided_slice %12 {offsets = [0, 8], sizes = [32, 8], strides = [1, 1]} : vector<32x16xf32> to vector<32x8xf32>
    %cst_11 = arith.constant 5.000000e-01 : f32
    %15 = vector.broadcast %cst_11 : f32 to vector<32x8xf32>
    %16 = arith.mulf %15, %13 : vector<32x8xf32>
    %17 = math.exp %16 : vector<32x8xf32>
    %c0_12 = arith.constant 0 : index
    %c0_13 = arith.constant 0 : index
    %18 = vector.load %arg6[%c0_12, %c0_13] : memref<32x8xf32, #tpu.memory_space<vmem>>, vector<32x8xf32>
    %19 = arith.mulf %17, %18 : vector<32x8xf32>
    %20 = arith.addf %19, %14 : vector<32x8xf32>
    %c0_14 = arith.constant 0 : index
    %c0_15 = arith.constant 0 : index
    %21 = vector.load %arg7[%c0_14, %c0_15] : memref<32x128xf32, #tpu.memory_space<vmem>>, vector<32x16xf32>
    tpu.vector_store %arg7[%c0_14, %c0_15], %12 {strides = array<i32>} : memref<32x128xf32, #tpu.memory_space<vmem>>, vector<32x16xf32>,
    %c0_16 = arith.constant 0 : index
    %c16 = arith.constant 16 : index
    %22 = vector.load %arg7[%c0_16, %c16] : memref<32x128xf32, #tpu.memory_space<vmem>>, vector<32x8xf32>
    tpu.vector_store %arg7[%c0_16, %c16], %20 {strides = array<i32>} : memref<32x128xf32, #tpu.memory_space<vmem>>, vector<32x8xf32>,
    %cst_17 = arith.constant 0.000000e+00 : f32
    %23 = vector.broadcast %cst_17 : f32 to vector<32x104xf32>
    %c0_18 = arith.constant 0 : index
    %c24 = arith.constant 24 : index
    %24 = vector.load %arg7[%c0_18, %c24] : memref<32x128xf32, #tpu.memory_space<vmem>>, vector<32x104xf32>
    tpu.vector_store %arg7[%c0_18, %c24], %23 {strides = array<i32>} : memref<32x128xf32, #tpu.memory_space<vmem>>, vector<32x104xf32>,
    return
  }
  func.func @transform_0(%arg0: i32) -> (i32, i32) {
    %c0_i32 = arith.constant 0 : i32
    %c0_i32_0 = arith.constant 0 : i32
    return %arg0, %c0_i32 : i32, i32
  }
  func.func @transform_1(%arg0: i32) -> (i32, i32) {
    %c0_i32 = arith.constant 0 : i32
    %c0_i32_0 = arith.constant 0 : i32
    %c0_i32_1 = arith.constant 0 : i32
    return %c0_i32, %c0_i32_0 : i32, i32
  }
  func.func @transform_2(%arg0: i32) -> (i32, i32) {
    %c0_i32 = arith.constant 0 : i32
    %c0_i32_0 = arith.constant 0 : i32
    %c0_i32_1 = arith.constant 0 : i32
    return %c0_i32, %c0_i32_0 : i32, i32
  }
  func.func @transform_3(%arg0: i32) -> (i32, i32) {
    %c0_i32 = arith.constant 0 : i32
    %c0_i32_0 = arith.constant 0 : i32
    %c0_i32_1 = arith.constant 0 : i32
    return %c0_i32, %c0_i32_0 : i32, i32
  }
  func.func @transform_4(%arg0: i32) -> (i32, i32) {
    %c0_i32 = arith.constant 0 : i32
    %c0_i32_0 = arith.constant 0 : i32
    %c0_i32_1 = arith.constant 0 : i32
    return %c0_i32, %c0_i32_0 : i32, i32
  }
  func.func @transform_5(%arg0: i32) -> (i32, i32) {
    %c0_i32 = arith.constant 0 : i32
    %c0_i32_0 = arith.constant 0 : i32
    return %arg0, %c0_i32 : i32, i32
  }
  func.func @transform_6(%arg0: i32) -> (i32, i32) {
    %c0_i32 = arith.constant 0 : i32
    %c0_i32_0 = arith.constant 0 : i32
    return %arg0, %c0_i32 : i32, i32
  }
}

</mosaic_0001>

<bundles_post_ra>
// kernel: tpu_custom_call.1
= control target key start
LH: loop header
LB: loop body
LE: loop exit
PB: predicated region body
PF: predicated region fallthrough
CT: control target
= control target key end

     0   :  { %vm34_vm0 = vcmask 130048   ;;  %s382_s0 = inlined_call_operand.vmem [shape: f32[32,16], index: 0, kind: input, shape index: {}]   ;;  %s383_s1 = inlined_call_operand.vmem [shape: f32[16,32], index: 1, kind: input, shape index: {}]   ;;  %s384_s2 = inlined_call_operand.vmem [shape: f32[1,32], index: 2, kind: input, shape index: {}]   ;;  %s385_s3 = inlined_call_operand.vmem [shape: f32[32,16], index: 3, kind: input, shape index: {}]   ;;  %s386_s4 = inlined_call_operand.vmem [shape: f32[1,16], index: 4, kind: input, shape index: {}]   ;;  %s387_s5 = inlined_call_operand.vmem [shape: f32[32,8], index: 5, kind: input, shape index: {}]   ;;  %s388_s6 = inlined_call_operand.hbm [shape: f32[32,128], index: 6, kind: output, shape index: {}]  }
   0x1   :  { %v29_v0 = vld [vmem:[%s383_s1 + $0x8] sm:$0xff]  ;;  %v28_v1 = vld [vmem:[%s383_s1] sm:$0xff]  ;;  %v83_v4 = vld [vmem:[%s385_s3 + $0x18] sm:$0xff] }
   0x2   :  { %61 = vmatpush.msra.mxu0 %v29_v0  ;;  %226 = vmatpush.msra.mxu3 %v29_v0  ;;  %v24_v2 = vld [vmem:[%s382_s0] sm:$0xff]  ;;  %v25_v3 = vld [vmem:[%s382_s0 + $0x8] sm:$0xff] }
   0x4   :  { %62 = vmatpush.msra.mxu0 %v28_v1  ;;  %227 = vmatpush.msra.mxu3 %v28_v1 }
   0x5   :  { %11 = vsyncpa [#allocation3], 0  ;;  %218 = vmatmul.msk.f32.vlgmr.msra.gmra.mxu0 %vm34_vm0, %v24_v2  ;;  %219 = vmatmul.msk.f32.vlgmr.msra.gmra.mxu3 %vm34_vm0, %v25_v3  ;;  %v26_v5 = vld [vmem:[%s382_s0 + $0x10] sm:$0xff]  ;;  %v27_v6 = vld [vmem:[%s382_s0 + $0x18] sm:$0xff]  ;;  %vm88_vm1 = vcmask 261120   ;;  %s275_s19 = smov 16  }
   0x6   :  { %113 = vmatpush.msra.mxu1 %v83_v4  ;;  %228 = vmatpush.msra.mxu2 %v83_v4  ;;  %v82_v7 = vld [vmem:[%s385_s3 + $0x10] sm:$0xff]  ;;  %v81_v8 = vld [vmem:[%s385_s3 + $0x8] sm:$0xff]  ;;  %v80_v9 = vld [vmem:[%s385_s3] sm:$0xff]  ;;  %vm190_vm2 = vcmask 195712   ;;  %vm195_vm3 = vcmask 1047744   ;;  %v276_v61 = vmov 0.0  }
   0x7   :  { %v238_v10 = vld [vmem:[%s384_s2] ss:$0 sm:$0xff]  ;;  %s274_s2 = smov 120   ;;  %v143_v43 = vld [vmem:[%s387_s5 + $0x8] sm:$0xff]  ;;  %v144_v51 = vld [vmem:[%s387_s5 + $0x10] sm:$0xff]  ;;  %s206_s29 = sshll.u32 %s388_s6, 4  ;;  %s207_s29 = int_to_ptr.hbm [resolvable:$true] %s206_s29 }
   0x8   :  { %114 = vmatpush.msra.mxu1 %v82_v7  ;;  %229 = vmatpush.msra.mxu2 %v82_v7  ;;  %v239_v23 = vld [vmem:[%s386_s4] ss:$0 sm:$0xff]  ;;  %v145_v56 = vld [vmem:[%s387_s5 + $0x18] sm:$0xff]  ;;  %s278_s30 = smov 128   ;;  %s279_s1 = smov 8  }
   0x9   :  { %v142_v37 = vld [vmem:[%s387_s5] sm:$0xff]  ;;  %s277_s5 = smov [#allocation2]  }
   0xa   :  { %115 = vmatpush.msra.mxu1 %v81_v8  ;;  %230 = vmatpush.msra.mxu2 %v81_v8  ;;  %s204_s26 = sshll.u32 %s277_s5, 4  ;;  %s205_s26 = int_to_ptr.vmem [resolvable:$true] %s204_s26 }
   0xc   :  { %116 = vmatpush.msra.mxu1 %v80_v9  ;;  %231 = vmatpush.msra.mxu2 %v80_v9 }
   0xd   :  { %220 = vmatmul.msk.f32.gmra.mxu3 %vm34_vm0, %v26_v5 }
  0x15   :  { %221 = vmatmul.msk.f32.gmra.mxu3 %vm34_vm0, %v27_v6 }
  0x82   :  { %v64_v11 = vpop.f32.mrf.mxu0 }
  0x83   :  { %v65_v12 = vadd.f32 %v238_v10, %v64_v11 }
  0x85   :  { %v76_v13 = vmax.f32 %v65_v12, 0.0 }
  0x87   :  { %222 = vmatmul.msk.f32.vlgmr.msra.gmra.mxu1 %vm88_vm1, %v76_v13 }
  0x88   :  { %v67_v14 = vpop.f32.mrf.mxu3 }
  0x89   :  { %v68_v15 = vadd.f32 %v238_v10, %v67_v14 }
  0x8b   :  { %v77_v16 = vmax.f32 %v68_v15, 0.0 }
  0x8f   :  { %223 = vmatmul.msk.f32.gmra.mxu1 %vm88_vm1, %v77_v16 }
  0x90   :  { %v70_v17 = vpop.f32.mrf.mxu3 }
  0x91   :  { %v71_v18 = vadd.f32 %v238_v10, %v70_v17 }
  0x93   :  { %v78_v19 = vmax.f32 %v71_v18, 0.0 }
  0x95   :  { %224 = vmatmul.msk.f32.vlgmr.msra.gmra.mxu2 %vm88_vm1, %v78_v19 }
  0x98   :  { %v73_v20 = vpop.f32.mrf.mxu3 }
  0x99   :  { %v74_v21 = vadd.f32 %v238_v10, %v73_v20 }
  0x9b   :  { %v79_v22 = vmax.f32 %v74_v21, 0.0 }
  0x9d   :  { %225 = vmatmul.msk.f32.gmra.mxu2 %vm88_vm1, %v79_v22 }
 0x104   :  { %v118_v24 = vpop.f32.mrf.mxu1 }
 0x105   :  { %v119_v25 = vadd.f32 %v239_v23, %v118_v24 }
 0x107   :  { %170 = vst.msk [vmem:[#allocation2] sm:$0xff] %vm34_vm0, %v119_v25  ;;  %154 = vrot.lane.b32.xlu0 %v119_v25, %s274_s2  ;;  %v130_v32 = vmul.f32 0.5, %v119_v25 }
 0x109   :  { %v134_v33 = vmul.f32 1.442695, %v130_v32 }
 0x10b   :  { %240 = vpow2.f32 %v134_v33 }
 0x10c   :  { %v121_v26 = vpop.f32.mrf.mxu1 }
 0x10d   :  { %v122_v27 = vadd.f32 %v239_v23, %v121_v26 }
 0x10f   :  { %171 = vst.msk [vmem:[#allocation2 + $0x8] sm:$0xff] %vm34_vm0, %v122_v27  ;;  %156 = vrot.lane.b32.xlu0 %v122_v27, %s274_s2  ;;  %v131_v34 = vmul.f32 0.5, %v122_v27 }
 0x111   :  { %v136_v35 = vmul.f32 1.442695, %v131_v34  ;;  %v241_v36 = vpop.eup %240 }
 0x112   :  { %v146_v38 = vmul.f32 %v241_v36, %v142_v37 }
 0x113   :  { %242 = vpow2.f32 %v136_v35 }
 0x118   :  { %v124_v28 = vpop.f32.mrf.mxu2 }
 0x119   :  { %v125_v29 = vadd.f32 %v239_v23, %v124_v28  ;;  %v243_v42 = vpop.eup %242 }
 0x11a   :  { %v147_v45 = vmul.f32 %v243_v42, %v143_v43 }
 0x11b   :  { %172 = vst.msk [vmem:[#allocation2 + $0x10] sm:$0xff] %vm34_vm0, %v125_v29  ;;  %158 = vrot.lane.b32.xlu1 %v125_v29, %s274_s2  ;;  %v132_v41 = vmul.f32 0.5, %v125_v29 }
 0x11d   :  { %v138_v44 = vmul.f32 1.442695, %v132_v41 }
 0x11f   :  { %244 = vpow2.f32 %v138_v44 }
 0x120   :  { %v127_v30 = vpop.f32.mrf.mxu2 }
 0x121   :  { %v128_v31 = vadd.f32 %v239_v23, %v127_v30 }
 0x123   :  { %173 = vst.msk [vmem:[#allocation2 + $0x18] sm:$0xff] %vm34_vm0, %v128_v31  ;;  %160 = vrot.lane.b32.xlu1 %v128_v31, %s274_s2  ;;  %v133_v48 = vmul.f32 0.5, %v128_v31 }
 0x125   :  { %v140_v49 = vmul.f32 1.442695, %v133_v48  ;;  %v245_v50 = vpop.eup %244 }
 0x126   :  { %v148_v52 = vmul.f32 %v245_v50, %v144_v51 }
 0x127   :  { %246 = vpow2.f32 %v140_v49 }
 0x12d   :  { %v247_v55 = vpop.eup %246 }
 0x12e   :  { %v149_v57 = vmul.f32 %v247_v55, %v145_v56 }
 0x179   :  { %v155_v39 = vpop.permute.xlu0 %154 }
 0x17a   :  { %v166_v40 = vadd.f32 %v155_v39, %v146_v38 }
 0x17c   :  { %178 = vrot.lane.b32.xlu2 %v166_v40, %s275_s19 }
 0x181   :  { %v157_v46 = vpop.permute.xlu0 %156 }
 0x182   :  { %v167_v47 = vadd.f32 %v157_v46, %v147_v45 }
 0x184   :  { %180 = vrot.lane.b32.xlu2 %v167_v47, %s275_s19 }
 0x18d   :  { %v159_v53 = vpop.permute.xlu1 %158 }
 0x18e   :  { %v168_v54 = vadd.f32 %v159_v53, %v148_v52 }
 0x190   :  { %182 = vrot.lane.b32.xlu0 %v168_v54, %s275_s19 }
 0x195   :  { %v161_v58 = vpop.permute.xlu1 %160 }
 0x196   :  { %v169_v59 = vadd.f32 %v161_v58, %v149_v57 }
 0x198   :  { %184 = vrot.lane.b32.xlu1 %v169_v59, %s275_s19 }
 0x1d6   :  { %v179_v60 = vpop.permute.xlu2 %178 }
 0x1d7   :  { %191 = vst.msk [vmem:[#allocation2] sm:$0xff] %vm190_vm2, %v179_v60 }
 0x1d8   :  { %196 = vst.msk [vmem:[#allocation2] sm:$0xff] %vm195_vm3, %v276_v61 }
 0x1de   :  { %v181_v62 = vpop.permute.xlu2 %180 }
 0x1df   :  { %192 = vst.msk [vmem:[#allocation2 + $0x8] sm:$0xff] %vm190_vm2, %v181_v62 }
 0x1e0   :  { %197 = vst.msk [vmem:[#allocation2 + $0x8] sm:$0xff] %vm195_vm3, %v276_v61 }
 0x202   :  { %v183_v63 = vpop.permute.xlu0 %182 }
 0x203   :  { %193 = vst.msk [vmem:[#allocation2 + $0x10] sm:$0xff] %vm190_vm2, %v183_v63 }
 0x204   :  { %198 = vst.msk [vmem:[#allocation2 + $0x10] sm:$0xff] %vm195_vm3, %v276_v61 }
 0x20a   :  { %v185_v0 = vpop.permute.xlu1 %184 }
 0x20b   :  { %194 = vst.msk [vmem:[#allocation2 + $0x18] sm:$0xff] %vm190_vm2, %v185_v0 }
 0x20c   :  { %199 = vst.msk [vmem:[#allocation2 + $0x18] sm:$0xff] %vm195_vm3, %v276_v61 }
 0x20d   :  { %212 = dma.vmem_to_hbm [thread:$0]  %s205_s26, 512, %s207_s29, [#allocation3], %s278_s30, %s278_s30, %s279_s1  }
 0x20e   :  { %272 = dma.done.wait [#allocation3], 512  }
 0x20f   :  { %273 = vsyncadd [#allocation3], 4294966784 }
 0x210   :  { %217 = vsyncpa [#allocation3], 1 }

</bundles_post_ra>
